<compile_context>
chip_gen: v7x
topology: tpu7x:2x2x1
jax: 0.10.0
libtpu: 0.0.40
codegen_flags: <defaults>
</compile_context>

<pallas_src>
import jax
import jax.numpy as jnp
import numpy as np
from jax import lax
from jax.experimental import pallas as pl
from jax.experimental.pallas import tpu as pltpu


def _attention_kernel(xq_ref, xkv_ref, wq_ref, wk_ref, wv_ref, wp_ref, bp_ref,
                      out_ref, q_scr, m_scr, l_scr, acc_scr, out_scr):
    # Grid = (B, n_q, H, n_k); refs (leading squeezed dims removed):
    #   xq_ref : (tq, C)   q-side x tile          xkv_ref: (tk, C) kv-side x tile
    #   wq/wk/wv/wp_ref : (C, C) this head's slab  bp_ref : (1, C)  proj bias (f32)
    #   out_ref: (tq, C)
    h = pl.program_id(2)
    ki = pl.program_id(3)
    nh = pl.num_programs(2)
    nk = pl.num_programs(3)

    # Reset the cross-head output accumulator at the start of each (b, q-tile).
    @pl.when(jnp.logical_and(h == 0, ki == 0))
    def _():
        out_scr[...] = jnp.zeros_like(out_scr)

    # New head: project q once (softmax scale already folded into wq) and reset
    # the online-softmax running stats.
    @pl.when(ki == 0)
    def _():
        q_scr[...] = jnp.dot(xq_ref[...], wq_ref[...],
                             preferred_element_type=jnp.float32
                             ).astype(q_scr.dtype)
        m_scr[...] = jnp.full_like(m_scr, -jnp.inf)
        l_scr[...] = jnp.zeros_like(l_scr)
        acc_scr[...] = jnp.zeros_like(acc_scr)

    # K / V projections for this head's kv tile (bf16 MXU operands, f32 acc).
    xkv = xkv_ref[...]
    k = jnp.dot(xkv, wk_ref[...],
                preferred_element_type=jnp.float32).astype(xkv.dtype)
    v = jnp.dot(xkv, wv_ref[...],
                preferred_element_type=jnp.float32).astype(xkv.dtype)

    # Scores: contract the feature dims directly ((tq,C) x (tk,C) -> (tq,tk)).
    s = lax.dot_general(q_scr[...], k, (((1,), (1,)), ((), ())),
                        preferred_element_type=jnp.float32)

    # Online softmax update (element-wise math kept in f32).
    m_prev = m_scr[...]
    m_new = jnp.maximum(m_prev, jnp.max(s, axis=-1, keepdims=True))
    alpha = jnp.exp(m_prev - m_new)
    p = jnp.exp(s - m_new)
    l_scr[...] = alpha * l_scr[...] + jnp.sum(p, axis=-1, keepdims=True)
    acc_scr[...] = alpha * acc_scr[...] + jnp.dot(
        p.astype(v.dtype), v, preferred_element_type=jnp.float32)
    m_scr[...] = m_new

    # Last kv tile of this head: normalize and fold the head straight into the
    # output projection accumulator.
    @pl.when(ki == nk - 1)
    def _():
        inv_l = pl.reciprocal(l_scr[...], approx=True)
        head_out = (acc_scr[...] * inv_l).astype(wp_ref.dtype)
        out_scr[...] += jnp.dot(head_out, wp_ref[...],
                                preferred_element_type=jnp.float32)

    # Last head & last kv tile: add bias and write the output tile.
    @pl.when(jnp.logical_and(h == nh - 1, ki == nk - 1))
    def _():
        out_ref[...] = (out_scr[...] + bp_ref[...]).astype(out_ref.dtype)


def self_attention_pallas(x, w_qkv, w_proj, b_proj, *, num_heads,
                          q_tile=None, kv_tile=None, mxu_dtype=jnp.bfloat16):
    """x: (B, T, C) f32.  w_qkv: (3*H*C, C) PyTorch (out, in).  w_proj: (C, H*C).
    b_proj: (C,).  Returns (B, T, C) in x.dtype."""
    B, T, C = x.shape
    H = num_heads
    head_dim = C // H
    scale = head_dim ** (-0.5)

    # Tile targets: 256 suits v6e/v7x MXU; pass q_tile/kv_tile=128 on v5e.
    tq = q_tile if q_tile is not None else min(T, 256)
    tk = kv_tile if kv_tile is not None else min(T, 256)
    assert T % tq == 0 and T % tk == 0, "T must be divisible by the tile sizes"
    n_q, n_k = T // tq, T // tk

    # --- one-time weight re-layout (would be pre-stored in a real model) ---
    # w_qkv rows are ordered o = which*(H*C) + h*C + c_out (PyTorch reshape).
    wqkv_r = w_qkv.reshape(3, H, C, C).transpose(0, 1, 3, 2)     # (3,H,C_in,C_out)
    wq = (wqkv_r[0] * scale).astype(mxu_dtype)    # fold softmax scale into wq
    wk = wqkv_r[1].astype(mxu_dtype)
    wv = wqkv_r[2].astype(mxu_dtype)
    wp = jnp.transpose(w_proj).reshape(H, C, C).astype(mxu_dtype)  # (H,C_in,C_out)
    bp = b_proj.reshape(1, C).astype(jnp.float32)
    x_mx = x.astype(mxu_dtype)                    # bf16 MXU operands, halves DMA

    grid = (B, n_q, H, n_k)

    out = pl.pallas_call(
        _attention_kernel,
        out_shape=jax.ShapeDtypeStruct((B, T, C), x.dtype),
        grid_spec=pltpu.PrefetchScalarGridSpec(
            num_scalar_prefetch=0,
            grid=grid,
            in_specs=[
                # q-side x tile (per b, q-tile)
                pl.BlockSpec((None, tq, C), lambda b, qi, h, ki: (b, qi, 0)),
                # kv-side x tile (per b, kv-tile)
                pl.BlockSpec((None, tk, C), lambda b, qi, h, ki: (b, ki, 0)),
                # per-head weight slabs, selected by the grid's head index
                pl.BlockSpec((None, C, C), lambda b, qi, h, ki: (h, 0, 0)),
                pl.BlockSpec((None, C, C), lambda b, qi, h, ki: (h, 0, 0)),
                pl.BlockSpec((None, C, C), lambda b, qi, h, ki: (h, 0, 0)),
                pl.BlockSpec((None, C, C), lambda b, qi, h, ki: (h, 0, 0)),
                # output-projection bias (invariant)
                pl.BlockSpec((1, C), lambda b, qi, h, ki: (0, 0)),
            ],
            out_specs=pl.BlockSpec((None, tq, C),
                                   lambda b, qi, h, ki: (b, qi, 0)),
            scratch_shapes=[
                pltpu.VMEM((tq, C), mxu_dtype),    # q (this head, MXU operand)
                pltpu.VMEM((tq, 1), jnp.float32),  # m  (running max)
                pltpu.VMEM((tq, 1), jnp.float32),  # l  (running denominator)
                pltpu.VMEM((tq, C), jnp.float32),  # acc (head context, f32)
                pltpu.VMEM((tq, C), jnp.float32),  # out accumulator over heads
            ],
        ),
        compiler_params=pltpu.CompilerParams(
            # (B, q-tile) independent -> shard across v7x's two TensorCores;
            # (H, kv-tile) are the reduction/revisit axes.
            dimension_semantics=("parallel", "parallel", "arbitrary", "arbitrary"),
            # Budget for v7x's 64 MiB VMEM (also fine on v5e/v6e).
            vmem_limit_bytes=64 * 1024 * 1024,
        ),
    )(x_mx, x_mx, wq, wk, wv, wp, bp)
    return out


def self_attention_ref(x, w_qkv, w_proj, b_proj, *, num_heads):
    """Pure-JAX f32 reference mirroring the PyTorch module."""
    B, T, C = x.shape
    H = num_heads
    scale = (C // H) ** (-0.5)
    qkv = jnp.einsum('btc,oc->bto', x, w_qkv)                   # (B, T, 3*H*C)
    qkv = qkv.reshape(B, T, 3, H, C).transpose(2, 0, 3, 1, 4)   # (3, B, H, T, C)
    q, k, v = qkv[0], qkv[1], qkv[2]
    attn = jax.nn.softmax(jnp.einsum('bhtc,bhsc->bhts', q, k) * scale, axis=-1)
    out = jnp.einsum('bhts,bhsc->bhtc', attn, v)                # (B, H, T, C)
    out = out.transpose(0, 2, 1, 3).reshape(B, T, H * C)
    return jnp.einsum('bth,oh->bto', out, w_proj) + b_proj


if __name__ == "__main__":
    B, T, dim, num_heads = 2, 8, 32, 2
    H, C = num_heads, dim

    key = jax.random.PRNGKey(0)
    kx, kq, kp, kb = jax.random.split(key, 4)

    x = jax.random.normal(kx, (B, T, C), dtype=jnp.float32)
    # Deterministic synthetic parameters (shapes follow nn.Linear: (out, in)).
    w_qkv = jax.random.normal(kq, (3 * H * C, C), dtype=jnp.float32) * 0.05
    w_proj = jax.random.normal(kp, (C, H * C), dtype=jnp.float32) * 0.05
    b_proj = jax.random.normal(kb, (C,), dtype=jnp.float32) * 0.05

    out = self_attention_pallas(x, w_qkv, w_proj, b_proj, num_heads=num_heads)
    out = jax.block_until_ready(out)

    ref = self_attention_ref(x, w_qkv, w_proj, b_proj, num_heads=num_heads)
    # Tolerance accounts for bf16 MXU operands (f32 accumulation) and the EUP
    # approximate reciprocal in the softmax normalization.
    np.testing.assert_allclose(np.asarray(out), np.asarray(ref),
                               rtol=2e-2, atol=2e-2)
    print("KERNEL_OK")
</pallas_src>

<mosaic_0001>
module attributes {stable_mosaic.version = 11 : i64} {
  func.func @_attention_kernel(%arg0: i32, %arg1: i32, %arg2: i32, %arg3: i32, %arg4: memref<1x8x32xbf16, #tpu.memory_space<vmem>>, %arg5: memref<1x8x32xbf16, #tpu.memory_space<vmem>>, %arg6: memref<1x32x32xbf16, #tpu.memory_space<vmem>>, %arg7: memref<1x32x32xbf16, #tpu.memory_space<vmem>>, %arg8: memref<1x32x32xbf16, #tpu.memory_space<vmem>>, %arg9: memref<1x32x32xbf16, #tpu.memory_space<vmem>>, %arg10: memref<1x32xf32, #tpu.memory_space<vmem>>, %arg11: memref<1x8x32xf32, #tpu.memory_space<vmem>>, %arg12: memref<8x32xbf16, #tpu.memory_space<vmem>>, %arg13: memref<8x1xf32, #tpu.memory_space<vmem>>, %arg14: memref<8x1xf32, #tpu.memory_space<vmem>>, %arg15: memref<8x32xf32, #tpu.memory_space<vmem>>, %arg16: memref<8x32xf32, #tpu.memory_space<vmem>>) attributes {dimension_semantics = [#tpu.dimension_semantics<parallel>, #tpu.dimension_semantics<parallel>, #tpu.dimension_semantics<arbitrary>, #tpu.dimension_semantics<arbitrary>], iteration_bounds = array<i64: 2, 1, 2, 1>, scalar_prefetch = 0 : i64, scratch_operands = 5 : i64, tpu.core_type = #tpu.core_type<tc>, window_params = [{transform_indices = @transform_0, window_bounds = array<i64: 1, 8, 32>}, {transform_indices = @transform_1, window_bounds = array<i64: 1, 8, 32>}, {transform_indices = @transform_2, window_bounds = array<i64: 1, 32, 32>}, {transform_indices = @transform_3, window_bounds = array<i64: 1, 32, 32>}, {transform_indices = @transform_4, window_bounds = array<i64: 1, 32, 32>}, {transform_indices = @transform_5, window_bounds = array<i64: 1, 32, 32>}, {pipeline_mode = #tpu.pipeline_mode<synchronous>, transform_indices = @transform_6, window_bounds = array<i64: 1, 32>}, {transform_indices = @transform_7, window_bounds = array<i64: 1, 8, 32>}]} {
    %c0_i32 = arith.constant 0 : i32
    %0 = arith.cmpi eq, %arg2, %c0_i32 : i32
    %c0_i32_0 = arith.constant 0 : i32
    %1 = arith.cmpi eq, %arg3, %c0_i32_0 : i32
    %2 = arith.andi %0, %1 : i1
    %3 = arith.extui %2 : i1 to i32
    %c0_i32_1 = arith.constant 0 : i32
    %4 = arith.cmpi ne, %3, %c0_i32_1 : i32
    scf.if %4 {
      %cst_35 = arith.constant 0.000000e+00 : f32
      %51 = vector.broadcast %cst_35 : f32 to vector<8x32xf32>
      %c0_36 = arith.constant 0 : index
      %c0_37 = arith.constant 0 : index
      %52 = vector.load %arg16[%c0_36, %c0_37] : memref<8x32xf32, #tpu.memory_space<vmem>>, vector<8x32xf32>
      tpu.vector_store %arg16[%c0_36, %c0_37], %51 {strides = array<i32>} : memref<8x32xf32, #tpu.memory_space<vmem>>, vector<8x32xf32>,
    } else {
    }
    %c0_i32_2 = arith.constant 0 : i32
    %5 = arith.cmpi eq, %arg3, %c0_i32_2 : i32
    %6 = arith.extui %5 : i1 to i32
    %c0_i32_3 = arith.constant 0 : i32
    %7 = arith.cmpi ne, %6, %c0_i32_3 : i32
    scf.if %7 {
      %c0_35 = arith.constant 0 : index
      %c0_36 = arith.constant 0 : index
      %c0_37 = arith.constant 0 : index
      %51 = vector.load %arg4[%c0_35, %c0_36, %c0_37] : memref<1x8x32xbf16, #tpu.memory_space<vmem>>, vector<1x8x32xbf16>
      %52 = vector.shape_cast %51 : vector<1x8x32xbf16> to vector<8x32xbf16>
      %c0_38 = arith.constant 0 : index
      %c0_39 = arith.constant 0 : index
      %c0_40 = arith.constant 0 : index
      %53 = vector.load %arg6[%c0_38, %c0_39, %c0_40] : memref<1x32x32xbf16, #tpu.memory_space<vmem>>, vector<1x32x32xbf16>
      %54 = vector.shape_cast %53 : vector<1x32x32xbf16> to vector<32x32xbf16>
      %cst_41 = arith.constant dense<0.000000e+00> : vector<8x32xf32>
      %55 = tpu.matmul %52, %54, %cst_41 {dimension_numbers = #tpu.dot_dimension_numbers<[1], [0], [0], [1], [0, 0, 1, 1], [], []>} : vector<8x32xbf16>, vector<32x32xbf16>, vector<8x32xf32> -> vector<8x32xf32>
      %56 = arith.truncf %55 : vector<8x32xf32> to vector<8x32xbf16>
      %c0_42 = arith.constant 0 : index
      %c0_43 = arith.constant 0 : index
      %57 = vector.load %arg12[%c0_42, %c0_43] : memref<8x32xbf16, #tpu.memory_space<vmem>>, vector<8x32xbf16>
      tpu.vector_store %arg12[%c0_42, %c0_43], %56 {strides = array<i32>} : memref<8x32xbf16, #tpu.memory_space<vmem>>, vector<8x32xbf16>,
      %cst_44 = arith.constant 0xFF800000 : f32
      %58 = vector.broadcast %cst_44 : f32 to vector<8x1xf32>
      %c0_45 = arith.constant 0 : index
      %c0_46 = arith.constant 0 : index
      %59 = vector.load %arg13[%c0_45, %c0_46] : memref<8x1xf32, #tpu.memory_space<vmem>>, vector<8x1xf32>
      tpu.vector_store %arg13[%c0_45, %c0_46], %58 {strides = array<i32>} : memref<8x1xf32, #tpu.memory_space<vmem>>, vector<8x1xf32>,
      %cst_47 = arith.constant 0.000000e+00 : f32
      %60 = vector.broadcast %cst_47 : f32 to vector<8x1xf32>
      %c0_48 = arith.constant 0 : index
      %c0_49 = arith.constant 0 : index
      %61 = vector.load %arg14[%c0_48, %c0_49] : memref<8x1xf32, #tpu.memory_space<vmem>>, vector<8x1xf32>
      tpu.vector_store %arg14[%c0_48, %c0_49], %60 {strides = array<i32>} : memref<8x1xf32, #tpu.memory_space<vmem>>, vector<8x1xf32>,
      %cst_50 = arith.constant 0.000000e+00 : f32
      %62 = vector.broadcast %cst_50 : f32 to vector<8x32xf32>
      %c0_51 = arith.constant 0 : index
      %c0_52 = arith.constant 0 : index
      %63 = vector.load %arg15[%c0_51, %c0_52] : memref<8x32xf32, #tpu.memory_space<vmem>>, vector<8x32xf32>
      tpu.vector_store %arg15[%c0_51, %c0_52], %62 {strides = array<i32>} : memref<8x32xf32, #tpu.memory_space<vmem>>, vector<8x32xf32>,
    } else {
    }
    %c0 = arith.constant 0 : index
    %c0_4 = arith.constant 0 : index
    %c0_5 = arith.constant 0 : index
    %8 = vector.load %arg5[%c0, %c0_4, %c0_5] : memref<1x8x32xbf16, #tpu.memory_space<vmem>>, vector<1x8x32xbf16>
    %9 = vector.shape_cast %8 : vector<1x8x32xbf16> to vector<8x32xbf16>
    %c0_6 = arith.constant 0 : index
    %c0_7 = arith.constant 0 : index
    %c0_8 = arith.constant 0 : index
    %10 = vector.load %arg7[%c0_6, %c0_7, %c0_8] : memref<1x32x32xbf16, #tpu.memory_space<vmem>>, vector<1x32x32xbf16>
    %11 = vector.shape_cast %10 : vector<1x32x32xbf16> to vector<32x32xbf16>
    %cst = arith.constant dense<0.000000e+00> : vector<8x32xf32>
    %12 = tpu.matmul %9, %11, %cst {dimension_numbers = #tpu.dot_dimension_numbers<[1], [0], [0], [1], [0, 0, 1, 1], [], []>} : vector<8x32xbf16>, vector<32x32xbf16>, vector<8x32xf32> -> vector<8x32xf32>
    %13 = arith.truncf %12 : vector<8x32xf32> to vector<8x32xbf16>
    %c0_9 = arith.constant 0 : index
    %c0_10 = arith.constant 0 : index
    %c0_11 = arith.constant 0 : index
    %14 = vector.load %arg8[%c0_9, %c0_10, %c0_11] : memref<1x32x32xbf16, #tpu.memory_space<vmem>>, vector<1x32x32xbf16>
    %15 = vector.shape_cast %14 : vector<1x32x32xbf16> to vector<32x32xbf16>
    %cst_12 = arith.constant dense<0.000000e+00> : vector<8x32xf32>
    %16 = tpu.matmul %9, %15, %cst_12 {dimension_numbers = #tpu.dot_dimension_numbers<[1], [0], [0], [1], [0, 0, 1, 1], [], []>} : vector<8x32xbf16>, vector<32x32xbf16>, vector<8x32xf32> -> vector<8x32xf32>
    %17 = arith.truncf %16 : vector<8x32xf32> to vector<8x32xbf16>
    %c0_13 = arith.constant 0 : index
    %c0_14 = arith.constant 0 : index
    %18 = vector.load %arg12[%c0_13, %c0_14] : memref<8x32xbf16, #tpu.memory_space<vmem>>, vector<8x32xbf16>
    %cst_15 = arith.constant dense<0.000000e+00> : vector<8x8xf32>
    %19 = tpu.matmul %18, %13, %cst_15 {dimension_numbers = #tpu.dot_dimension_numbers<[1], [1], [0], [0], [0, 0, 1, 0], [], []>} : vector<8x32xbf16>, vector<8x32xbf16>, vector<8x8xf32> -> vector<8x8xf32>
    %c0_16 = arith.constant 0 : index
    %c0_17 = arith.constant 0 : index
    %20 = vector.load %arg13[%c0_16, %c0_17] : memref<8x1xf32, #tpu.memory_space<vmem>>, vector<8x1xf32>
    %cst_18 = arith.constant dense<0xFF800000> : vector<8xf32>
    %21 = vector.multi_reduction <maximumf>, %19, %cst_18 [1] : vector<8x8xf32> to vector<8xf32>
    %22 = vector.shape_cast %21 : vector<8xf32> to vector<8x1xf32>
    %23 = arith.maximumf %20, %22 : vector<8x1xf32>
    %24 = arith.subf %20, %23 : vector<8x1xf32>
    %25 = math.exp %24 : vector<8x1xf32>
    %26 = vector.broadcast %23 : vector<8x1xf32> to vector<8x8xf32>
    %27 = arith.subf %19, %26 : vector<8x8xf32>
    %28 = math.exp %27 : vector<8x8xf32>
    %c0_19 = arith.constant 0 : index
    %c0_20 = arith.constant 0 : index
    %29 = vector.load %arg14[%c0_19, %c0_20] : memref<8x1xf32, #tpu.memory_space<vmem>>, vector<8x1xf32>
    %30 = arith.mulf %25, %29 : vector<8x1xf32>
    %cst_21 = arith.constant dense<0.000000e+00> : vector<8xf32>
    %31 = vector.multi_reduction <add>, %28, %cst_21 [1] : vector<8x8xf32> to vector<8xf32>
    %32 = vector.shape_cast %31 : vector<8xf32> to vector<8x1xf32>
    %33 = arith.addf %30, %32 : vector<8x1xf32>
    %c0_22 = arith.constant 0 : index
    %c0_23 = arith.constant 0 : index
    %34 = vector.load %arg14[%c0_22, %c0_23] : memref<8x1xf32, #tpu.memory_space<vmem>>, vector<8x1xf32>
    tpu.vector_store %arg14[%c0_22, %c0_23], %33 {strides = array<i32>} : memref<8x1xf32, #tpu.memory_space<vmem>>, vector<8x1xf32>,
    %c0_24 = arith.constant 0 : index
    %c0_25 = arith.constant 0 : index
    %35 = vector.load %arg15[%c0_24, %c0_25] : memref<8x32xf32, #tpu.memory_space<vmem>>, vector<8x32xf32>
    %36 = vector.broadcast %25 : vector<8x1xf32> to vector<8x32xf32>
    %37 = arith.mulf %36, %35 : vector<8x32xf32>
    %38 = arith.truncf %28 : vector<8x8xf32> to vector<8x8xbf16>
    %cst_26 = arith.constant dense<0.000000e+00> : vector<8x32xf32>
    %39 = tpu.matmul %38, %17, %cst_26 {dimension_numbers = #tpu.dot_dimension_numbers<[1], [0], [0], [1], [0, 0, 1, 1], [], []>} : vector<8x8xbf16>, vector<8x32xbf16>, vector<8x32xf32> -> vector<8x32xf32>
    %40 = arith.addf %37, %39 : vector<8x32xf32>
    %c0_27 = arith.constant 0 : index
    %c0_28 = arith.constant 0 : index
    %41 = vector.load %arg15[%c0_27, %c0_28] : memref<8x32xf32, #tpu.memory_space<vmem>>, vector<8x32xf32>
    tpu.vector_store %arg15[%c0_27, %c0_28], %40 {strides = array<i32>} : memref<8x32xf32, #tpu.memory_space<vmem>>, vector<8x32xf32>,
    %c0_29 = arith.constant 0 : index
    %c0_30 = arith.constant 0 : index
    %42 = vector.load %arg13[%c0_29, %c0_30] : memref<8x1xf32, #tpu.memory_space<vmem>>, vector<8x1xf32>
    tpu.vector_store %arg13[%c0_29, %c0_30], %23 {strides = array<i32>} : memref<8x1xf32, #tpu.memory_space<vmem>>, vector<8x1xf32>,
    %c0_i32_31 = arith.constant 0 : i32
    %43 = arith.cmpi eq, %arg3, %c0_i32_31 : i32
    %44 = arith.extui %43 : i1 to i32
    %c0_i32_32 = arith.constant 0 : i32
    %45 = arith.cmpi ne, %44, %c0_i32_32 : i32
    scf.if %45 {
      %c0_35 = arith.constant 0 : index
      %c0_36 = arith.constant 0 : index
      %51 = vector.load %arg14[%c0_35, %c0_36] : memref<8x1xf32, #tpu.memory_space<vmem>>, vector<8x1xf32>
      %52 = tpu.reciprocal %51 {approx = true} : vector<8x1xf32> -> vector<8x1xf32>
      %c0_37 = arith.constant 0 : index
      %c0_38 = arith.constant 0 : index
      %53 = vector.load %arg15[%c0_37, %c0_38] : memref<8x32xf32, #tpu.memory_space<vmem>>, vector<8x32xf32>
      %54 = vector.broadcast %52 : vector<8x1xf32> to vector<8x32xf32>
      %55 = arith.mulf %53, %54 : vector<8x32xf32>
      %56 = arith.truncf %55 : vector<8x32xf32> to vector<8x32xbf16>
      %c0_39 = arith.constant 0 : index
      %c0_40 = arith.constant 0 : index
      %57 = vector.load %arg16[%c0_39, %c0_40] : memref<8x32xf32, #tpu.memory_space<vmem>>, vector<8x32xf32>
      %c0_41 = arith.constant 0 : index
      %c0_42 = arith.constant 0 : index
      %c0_43 = arith.constant 0 : index
      %58 = vector.load %arg9[%c0_41, %c0_42, %c0_43] : memref<1x32x32xbf16, #tpu.memory_space<vmem>>, vector<1x32x32xbf16>
      %59 = vector.shape_cast %58 : vector<1x32x32xbf16> to vector<32x32xbf16>
      %cst_44 = arith.constant dense<0.000000e+00> : vector<8x32xf32>
      %60 = tpu.matmul %56, %59, %cst_44 {dimension_numbers = #tpu.dot_dimension_numbers<[1], [0], [0], [1], [0, 0, 1, 1], [], []>} : vector<8x32xbf16>, vector<32x32xbf16>, vector<8x32xf32> -> vector<8x32xf32>
      %61 = arith.addf %57, %60 : vector<8x32xf32>
      %c0_45 = arith.constant 0 : index
      %c0_46 = arith.constant 0 : index
      %62 = vector.load %arg16[%c0_45, %c0_46] : memref<8x32xf32, #tpu.memory_space<vmem>>, vector<8x32xf32>
      tpu.vector_store %arg16[%c0_45, %c0_46], %61 {strides = array<i32>} : memref<8x32xf32, #tpu.memory_space<vmem>>, vector<8x32xf32>,
    } else {
    }
    %c1_i32 = arith.constant 1 : i32
    %46 = arith.cmpi eq, %arg2, %c1_i32 : i32
    %c0_i32_33 = arith.constant 0 : i32
    %47 = arith.cmpi eq, %arg3, %c0_i32_33 : i32
    %48 = arith.andi %46, %47 : i1
    %49 = arith.extui %48 : i1 to i32
    %c0_i32_34 = arith.constant 0 : i32
    %50 = arith.cmpi ne, %49, %c0_i32_34 : i32
    scf.if %50 {
      %c0_35 = arith.constant 0 : index
      %c0_36 = arith.constant 0 : index
      %51 = vector.load %arg16[%c0_35, %c0_36] : memref<8x32xf32, #tpu.memory_space<vmem>>, vector<8x32xf32>
      %c0_37 = arith.constant 0 : index
      %c0_38 = arith.constant 0 : index
      %52 = vector.load %arg10[%c0_37, %c0_38] : memref<1x32xf32, #tpu.memory_space<vmem>>, vector<1x32xf32>
      %53 = vector.broadcast %52 : vector<1x32xf32> to vector<8x32xf32>
      %54 = arith.addf %51, %53 : vector<8x32xf32>
      %c0_39 = arith.constant 0 : index
      %c0_40 = arith.constant 0 : index
      %c0_41 = arith.constant 0 : index
      %55 = vector.load %arg11[%c0_39, %c0_40, %c0_41] : memref<1x8x32xf32, #tpu.memory_space<vmem>>, vector<1x8x32xf32>
      %56 = vector.shape_cast %55 : vector<1x8x32xf32> to vector<8x32xf32>
      %57 = vector.shape_cast %54 : vector<8x32xf32> to vector<1x8x32xf32>
      tpu.vector_store %arg11[%c0_39, %c0_40, %c0_41], %57 {strides = array<i32>} : memref<1x8x32xf32, #tpu.memory_space<vmem>>, vector<1x8x32xf32>,
    } else {
    }
    return
  }
  func.func @transform_0(%arg0: i32, %arg1: i32, %arg2: i32, %arg3: i32) -> (i32, i32, i32) {
    %c0_i32 = arith.constant 0 : i32
    %c0_i32_0 = arith.constant 0 : i32
    return %arg0, %arg1, %c0_i32 : i32, i32, i32
  }
  func.func @transform_1(%arg0: i32, %arg1: i32, %arg2: i32, %arg3: i32) -> (i32, i32, i32) {
    %c0_i32 = arith.constant 0 : i32
    %c0_i32_0 = arith.constant 0 : i32
    return %arg0, %arg3, %c0_i32 : i32, i32, i32
  }
  func.func @transform_2(%arg0: i32, %arg1: i32, %arg2: i32, %arg3: i32) -> (i32, i32, i32) {
    %c0_i32 = arith.constant 0 : i32
    %c0_i32_0 = arith.constant 0 : i32
    %c0_i32_1 = arith.constant 0 : i32
    return %arg2, %c0_i32, %c0_i32_0 : i32, i32, i32
  }
  func.func @transform_3(%arg0: i32, %arg1: i32, %arg2: i32, %arg3: i32) -> (i32, i32, i32) {
    %c0_i32 = arith.constant 0 : i32
    %c0_i32_0 = arith.constant 0 : i32
    %c0_i32_1 = arith.constant 0 : i32
    return %arg2, %c0_i32, %c0_i32_0 : i32, i32, i32
  }
  func.func @transform_4(%arg0: i32, %arg1: i32, %arg2: i32, %arg3: i32) -> (i32, i32, i32) {
    %c0_i32 = arith.constant 0 : i32
    %c0_i32_0 = arith.constant 0 : i32
    %c0_i32_1 = arith.constant 0 : i32
    return %arg2, %c0_i32, %c0_i32_0 : i32, i32, i32
  }
  func.func @transform_5(%arg0: i32, %arg1: i32, %arg2: i32, %arg3: i32) -> (i32, i32, i32) {
    %c0_i32 = arith.constant 0 : i32
    %c0_i32_0 = arith.constant 0 : i32
    %c0_i32_1 = arith.constant 0 : i32
    return %arg2, %c0_i32, %c0_i32_0 : i32, i32, i32
  }
  func.func @transform_6(%arg0: i32, %arg1: i32, %arg2: i32, %arg3: i32) -> (i32, i32) {
    %c0_i32 = arith.constant 0 : i32
    %c0_i32_0 = arith.constant 0 : i32
    %c0_i32_1 = arith.constant 0 : i32
    return %c0_i32, %c0_i32_0 : i32, i32
  }
  func.func @transform_7(%arg0: i32, %arg1: i32, %arg2: i32, %arg3: i32) -> (i32, i32, i32) {
    %c0_i32 = arith.constant 0 : i32
    %c0_i32_0 = arith.constant 0 : i32
    return %arg0, %arg1, %c0_i32 : i32, i32, i32
  }
}

</mosaic_0001>

<bundles_post_ra>
// kernel: tpu_custom_call.1
= control target key start
LH: loop header
LB: loop body
LE: loop exit
PB: predicated region body
PF: predicated region fallthrough
CT: control target
= control target key end

     0   :  { %s2408_s0 = inlined_call_operand.hbm [shape: bf16[2,8,32], index: 0, kind: input, shape index: {}]   ;;  %s2409_s1 = inlined_call_operand.hbm [shape: bf16[2,8,32], index: 1, kind: input, shape index: {}]   ;;  %s2410_s2 = inlined_call_operand.hbm [shape: bf16[2,32,32], index: 2, kind: input, shape index: {}]   ;;  %s2411_s3 = inlined_call_operand.hbm [shape: bf16[2,32,32], index: 3, kind: input, shape index: {}]   ;;  %s2412_s4 = inlined_call_operand.hbm [shape: bf16[2,32,32], index: 4, kind: input, shape index: {}]   ;;  %s2413_s5 = inlined_call_operand.hbm [shape: bf16[2,32,32], index: 5, kind: input, shape index: {}]   ;;  %s2414_s6 = inlined_call_operand.hbm [shape: f32[1,32], index: 6, kind: input, shape index: {}]   ;;  %s2415_s7 = inlined_call_operand.hbm [shape: f32[2,8,32], index: 7, kind: output, shape index: {}]  }
   0x1   :  { %2445 = sst [smem:[#allocation41_spill]] %s2409_s1 }
   0x2   :  { %2446 = sst [smem:[#allocation42_spill]] %s2411_s3 }
   0x3   :  { %2447 = sst [smem:[#allocation43_spill]] %s2414_s6 }
   0x4   :  { %2448 = sst [smem:[#allocation44_spill]] %s2415_s7 }
   0x5   :  { %12 = vsyncpa [#allocation8], 0 }
   0x6   :  { %14 = vsyncpa [#allocation8 + $0x1], 0 }
   0x7   :  { %15 = vsyncpa [#allocation11], 0 }
   0x8   :  { %17 = vsyncpa [#allocation11 + $0x1], 0 }
   0x9   :  { %18 = vsyncpa [#allocation14], 0 }
   0xa   :  { %20 = vsyncpa [#allocation14 + $0x1], 0 }
   0xb   :  { %21 = vsyncpa [#allocation17], 0 }
   0xc   :  { %23 = vsyncpa [#allocation17 + $0x1], 0 }
   0xd   :  { %24 = vsyncpa [#allocation9], 0 }
   0xe   :  { %26 = vsyncpa [#allocation9 + $0x1], 0  ;;  %s1858_s24 = smov 0   ;;  %s1860_s25 = smov 0  }
   0xf   :  { %s1862_s26 = smov 0   ;;  %s1864_s27 = smov 0  }
  0x10   :  { %s1866_s28 = smov 0   ;;  %s1868_s29 = smov 0  }
  0x11   :  { %s1870_s30 = smov 0   ;;  %s1872_s8 = smov 0  }
  0x12   :  { %s1874_s9 = smov 0   ;;  %s1876_s10 = smov 0  }
  0x13   :  { %s1878_s11 = smov 0  }
  0x14 LB: > { %2449 = sst [smem:[#allocation27_spill]] %s1765_s25  ;;  %s1912_s12 = sadd.s32 4294967295, %s1801_s11   ;;  %s1801_s11 = sphi %s1878_s11, %s32_s11   ;;  %s1797_s10 = sphi %s1876_s10, %s2517_s10   ;;  %s1793_s9 = sphi %s1874_s9, %s2511_s9   ;;  %s1789_s8 = sphi %s1872_s8, %s2516_s8   ;;  %s1785_s30 = sphi %s1870_s30, %s2510_s30   ;;  %s1781_s29 = sphi %s1868_s29, %s2515_s29   ;;  %s1777_s28 = sphi %s1866_s28, %s2514_s28   ;;  %s1773_s27 = sphi %s1864_s27, %s2513_s27   ;;  %s1769_s26 = sphi %s1862_s26, %s2508_s26   ;;  %s1765_s25 = sphi %s1860_s25, %s2507_s25   ;;  %s1761_s24 = sphi %s1858_s24, %s2506_s24  }
  0x15   : > { %2450 = sst [smem:[#allocation28_spill]] %s1769_s26  ;;  %s1174_s13 = sadd.s32 4294967294, %s1801_s11  }
  0x16   : > { %2451 = sst [smem:[#allocation29_spill]] %s1773_s27  ;;  %p80_p0 = scmp.ne.s32.totalorder %s1777_s28, %s1773_s27 }
  0x17   : > { %2452 = sst [smem:[#allocation30_spill]] %s1785_s30  ;;  %p2419_p1 = scmp.eq.s32.totalorder %s1912_s12, 0 }
  0x18   : > { %2453 = sst [smem:[#allocation31_spill]] %s1789_s8  ;;  %p134_p4 = scmp.ne.s32.totalorder %s1765_s25, %s1761_s24 }
  0x19   : > { %2454 = sst [smem:[#allocation32_spill]] %s1793_s9  ;;  %p1923_p3 = por %p2419_p1, %p80_p0 }
  0x1a   : > { %2455 = sst [smem:[#allocation33_spill]] %s1801_s11  ;;  %p265_p6 = scmp.eq.s32.totalorder %s1174_s13, 3 }
  0x1b   : > { %s2456_s15 = scalar_select %p1923_p3, 1, 0 }
  0x1c   : > { %p1931_p7 = por %p134_p4, %p2419_p1  ;;  %p1175_p8 = scmp.ge.s32.totalorder %s1801_s11, 1 }
  0x1d   : > { %p1936_p9 = por %p265_p6, %p80_p0  ;;  %p272_p10 = scmp.lt.s32.totalorder %s1801_s11, 5 }
  0x1e   : > { %s2457_s16 = scalar_select %p1931_p7, 1, 0 }
  0x1f   : > { %s2459_s17 = scalar_select %p1936_p9, 1, 0 }
  0x20   : > { %2458 = sst [smem:[#allocation34_spill]] %s2457_s16  ;;  %p1941_p11 = pnand %p1175_p8, %p272_p10 }
  0x21   : > { %2460 = sst [smem:[#allocation35_spill]] %s2459_s17  ;;  %s1803_s19 = smov [#allocation18]  }
  0x22   : > { %s2461_s18 = scalar_select %p1941_p11, 1, 0 }
  0x23   : > { %s285_s20 = sshll.u32 %s1803_s19, 4  ;;  %p1308_p12 = pneg %p1941_p11  ;;  %s286_s20 = int_to_ptr.vmem [resolvable:$true] %s285_s20 }
  0x24   : > { %s50_s22 = sadd.s32 1, %s1793_s9  ;;  %s2463_s6 = sld [smem:[#allocation43_spill]] }
  0x25   : > { %p1949_p13 = pnand %p1308_p12, %p2419_p1 }
  0x27   : > { %p1453_p4 = pneg %p1949_p13 }
  0x2a   : > { %s1451_s13 = scalar_lea.hbm %s2463_s6, 16 }
  0x2b   : > { %p1452_p0 = scmp.ne.s32.totalorder %s2463_s6, %s1451_s13  ;;  %p1458_p10 = scmp.lt.u32.totalorder %s1451_s13, %s2463_s6 }
  0x2d   : > { %p1454_p6 = pnand %p1453_p4, %p1452_p0 }
  0x2f   : > { %p1455_p8 = pneg %p1454_p6 }
  0x31   : > { %p1460_p12 = pnand %p1458_p10, %p1455_p8 }
  0x33   : > { %1463 = shalt.err (!%p1460_p12)
}
  0x34   : > { %s1464_s7 = scalar_lea.vmem %s286_s20, 16  ;;  %s1471_s23 = scalar_lea.vmem %s286_s20, 32 }
  0x35   : > { %p1465_p1 = scmp.ne.s32.totalorder %s286_s20, %s1464_s7  ;;  %p1472_p9 = scmp.lt.s32.totalorder %s286_s20, %s286_s20 }
  0x36   : > { %p1473_p7 = scmp.lt.s32.totalorder %s1471_s23, %s1464_s7 }
  0x37   : > { %p1467_p5 = pnand %p1465_p1, %p1453_p4 }
  0x38   : > { %p1474_p3 = por %p1473_p7, %p1472_p9 }
  0x39   : > { %p1468_p2 = pneg %p1467_p5 }
  0x3b   : > { %p1475_p11 = pnand %p1474_p3, %p1468_p2 }
  0x3d   : > { %1478 = shalt.err (!%p1475_p11)
}
  0x3e   : > { %1311 = dma.hbm_to_vmem [thread:$0]  (!%p1949_p13), %s2463_s6, 16, %s286_s20, [#allocation17]  }
  0x3f   : > { %p52_p1 = scmp.ge.s32.totalorder %s50_s22, 2  ;;  %s58_s7 = sadd.s32 1, %s1797_s10 }
  0x40   : > { %s67_s27 = sadd.s32 1, %s1781_s29  ;;  %p74_p2 = scmp.ne.s32.totalorder %s1781_s29, %s1777_s28 }
  0x41   : > { %s2519_s22 = smov (%p52_p1, %s50_s22), 0  ;;  %s2521_s7 = smov (!%p52_p1, %s58_s7), %s1797_s10 }
  0x42   : > { %2464 = sst [smem:[#allocation36_spill]] %s2519_s22  ;;  %p75_p3 = scmp.eq.s32.totalorder %s1801_s11, 0 }
  0x43   : > { %s118_s21 = ssub.s32 %s1793_s9, %s2519_s22  ;;  %p60_p5 = scmp.ge.s32.totalorder %s2521_s7, 2 }
  0x44   : > { %p119_p7 = scmp.eq.s32.totalorder %s118_s21, 0  ;;  %p76_p9 = por %p75_p3, %p74_p2 }
  0x45   : > { %p2465_p11 = scmp.ne.s32.totalorder %s1769_s26, %s1765_s25  ;;  %s2523_s7 = smov (%p60_p5, %s2521_s7), 0 }
  0x46   : > { %2467 = sst [smem:[#allocation37_spill]] %s2523_s7  ;;  %s2468_s24 = sadd.s32 1, %s1769_s26 }
  0x47   : > { %p1983_p13 = por %p2465_p11, %p75_p3  ;;  %s62_s19 = ssub.s32 %s1797_s10, %s2523_s7 }
  0x48   : > { %s1992_s13 = scalar_select %p119_p7, %s1769_s26, %s2468_s24  }
  0x49   : > { %p2470_p0 = scmp.eq.s32.totalorder %s1912_s12, 3  ;;  %p65_p6 = scmp.eq.s32.totalorder %s62_s19, 0 }
  0x4a   : > { %2469 = sst [smem:[#allocation38_spill]] %s1992_s13  ;;  %p1336_p8 = scmp.lt.s32.totalorder %s1801_s11, 4 }
  0x4b   : > { %p1998_p4 = por %p2470_p0, %p74_p2  ;;  %s2425_s14 = sand.u32 1, %s1781_s29  }
  0x4c   : > { %s2430_s17 = sshll.u32 %s1797_s10, 6  ;;  %s2010_s6 = sshll.u32 %s2425_s14, 2 }
  0x4d   : > { %s2471_s23 = scalar_select %p1998_p4, 1, 0 }
  0x4e   : > { %s2006_s21 = scalar_select %p65_p6, %s1781_s29, %s67_s27  }
  0x4f   : > { %2472 = sst [smem:[#allocation39_spill]] %s2471_s23  ;;  %p2012_p10 = pnand %p1336_p8, %p76_p9 }
  0x50   : > { %2473 = sst [smem:[#allocation40_spill]] %s2006_s21  ;;  %s2017_s24 = sand.u32 1, %s1801_s11  }
  0x51   : > { %s2474_s22 = scalar_select %p2012_p10, 1, 0 }
  0x52   : > { %s2475_s1 = sld [smem:[#allocation41_spill]]  ;;  %s319_s27 = scalar_lea.vmem [#allocation10], %s2010_s6 }
  0x53   : > { %s327_s14 = sshll.u32 %s319_s27, 4  ;;  %p2031_p12 = pnand %p1336_p8, %p1983_p13  ;;  %s2027_s14 = int_to_ptr.vmem [resolvable:$true] %s327_s14 }
  0x54   : > { %s2432_s11 = scalar_lea.sflag [#allocation11], %s2017_s24  ;;  %p2434_p2 = pneg %p2012_p10 }
  0x55   : > { %s2476_s21 = scalar_select %p2031_p12, 1, 0 }
  0x58   : > { %s2024_s13 = scalar_lea.hbm %s2475_s1, %s2430_s17  ;;  %s1484_s27 = scalar_lea.hbm %s2475_s1, 128 }
  0x59   : > { %s1479_s23 = scalar_lea.hbm %s2024_s13, 64  ;;  %p1485_p7 = scmp.lt.u32.totalorder %s2024_s13, %s2475_s1 }
  0x5a   : > { %p1480_p1 = scmp.ne.s32.totalorder %s2024_s13, %s1479_s23  ;;  %p1486_p9 = scmp.lt.u32.totalorder %s1484_s27, %s1479_s23 }
  0x5b   : > { %p1488_p13 = scmp.lt.u32.totalorder %s1479_s23, %s2024_s13 }
  0x5c   : > { %p1482_p3 = pnand %p2434_p2, %p1480_p1  ;;  %p1487_p11 = por %p1486_p9, %p1485_p7 }
  0x5e   : > { %p1483_p5 = pneg %p1482_p3  ;;  %p1489_p0 = por %p1488_p13, %p1487_p11 }
  0x60   : > { %p1490_p6 = pnand %p1489_p0, %p1483_p5 }
  0x62   : > { %1493 = shalt.err (!%p1490_p6)
}
  0x63   : > { %s1494_s20 = scalar_lea.vmem %s2027_s14, 64  ;;  %s1804_s7 = smov [#allocation10]  }
  0x64   : > { %p1495_p8 = scmp.ne.s32.totalorder %s2027_s14, %s1494_s20  ;;  %s1499_s19 = sshll.u32 %s1804_s7, 4  ;;  %s1500_s19 = int_to_ptr.vmem [resolvable:$false] %s1499_s19 }
  0x65   : > { %s1501_s8 = scalar_lea.vmem %s1500_s19, 128  ;;  %p1502_p4 = scmp.lt.s32.totalorder %s2027_s14, %s1500_s19 }
  0x66   : > { %p1497_p1 = pnand %p1495_p8, %p2434_p2  ;;  %p1503_p7 = scmp.lt.s32.totalorder %s1501_s8, %s1494_s20 }
  0x68   : > { %p1498_p3 = pneg %p1497_p1  ;;  %p1504_p9 = por %p1503_p7, %p1502_p4 }
  0x6a   : > { %p1505_p11 = pnand %p1504_p9, %p1498_p3 }
  0x6c   : > { %1508 = shalt.err (!%p1505_p11)
}
  0x6d   : > { %1318 = dma.hbm_to_vmem [thread:$0]  (!%p2012_p10), %s2024_s13, 64, %s2027_s14, %s2432_s11  }
  0x6e   : > { %s336_s23 = sand.u32 1, %s1769_s26   ;;  %s2067_s27 = sshll.u32 %s1793_s9, 8 }
  0x6f   : > { %s2064_s17 = sshll.u32 %s336_s23, 4  ;;  %s2477_s3 = sld [smem:[#allocation42_spill]] }
  0x70   : > { %s359_s8 = scalar_lea.vmem [#allocation13], %s2064_s17  ;;  %p2083_p5 = pneg %p2031_p12 }
  0x71   : > { %s366_s1 = sshll.u32 %s359_s8, 4  ;;  %s2076_s1 = int_to_ptr.vmem [resolvable:$true] %s366_s1 }
  0x72   : > { %s2478_s23 = scalar_select %p2083_p5, 1, 0 }
  0x75   : > { %s2073_s19 = scalar_lea.hbm %s2477_s3, %s2067_s27  ;;  %s1514_s11 = scalar_lea.hbm %s2477_s3, 512 }
  0x76   : > { %s1509_s14 = scalar_lea.hbm %s2073_s19, 256  ;;  %p1515_p6 = scmp.lt.u32.totalorder %s2073_s19, %s2477_s3 }
  0x77   : > { %p1510_p4 = scmp.ne.s32.totalorder %s2073_s19, %s1509_s14  ;;  %p1516_p8 = scmp.lt.u32.totalorder %s1514_s11, %s1509_s14 }
  0x78   : > { %p1518_p3 = scmp.lt.u32.totalorder %s1509_s14, %s2073_s19 }
  0x79   : > { %p1512_p13 = pnand %p2083_p5, %p1510_p4  ;;  %p1517_p1 = por %p1516_p8, %p1515_p6 }
  0x7b   : > { %p1513_p0 = pneg %p1512_p13  ;;  %p1519_p7 = por %p1518_p3, %p1517_p1 }
  0x7d   : > { %p1520_p9 = pnand %p1519_p7, %p1513_p0 }
  0x7f   : > { %1523 = shalt.err (!%p1520_p9)
}
  0x80   : > { %s1524_s13 = scalar_lea.vmem %s2076_s1, 256  ;;  %s1805_s20 = smov [#allocation13]  }
  0x81   : > { %p1525_p11 = scmp.ne.s32.totalorder %s2076_s1, %s1524_s13  ;;  %s1529_s7 = sshll.u32 %s1805_s20, 4  ;;  %s1530_s7 = int_to_ptr.vmem [resolvable:$false] %s1529_s7 }
  0x82   : > { %s1531_s9 = scalar_lea.vmem %s1530_s7, 512  ;;  %p1532_p2 = scmp.lt.s32.totalorder %s2076_s1, %s1530_s7 }
  0x83   : > { %p1527_p4 = pnand %p1525_p11, %p2083_p5  ;;  %p1533_p10 = scmp.lt.s32.totalorder %s1531_s9, %s1524_s13 }
  0x85   : > { %p1528_p13 = pneg %p1527_p4  ;;  %p1534_p6 = por %p1533_p10, %p1532_p2 }
  0x87   : > { %p1535_p8 = pnand %p1534_p6, %p1528_p13 }
  0x89   : > { %1538 = shalt.err (!%p1535_p8)
}
  0x8a   : > { %s1806_s11 = smov 64   ;;  %s1807_s14 = smov 4  }
  0x8b   : > { %s2479_s8 = scalar_lea.sflag [#allocation14], %s2017_s24  ;;  %s2480_s13 = sshll.u32 %s1797_s10, 6 }
  0x8c   : > { %1324 = dma.hbm_to_vmem [thread:$0]  (!%p2031_p12), %s2073_s19, 256, %s2076_s1, %s2479_s8, %s1806_s11, %s1806_s11, %s1807_s14  }
  0x8d   : > { %s2116_s9 = scalar_lea.hbm %s2408_s0, %s2480_s13  ;;  %s300_s3 = scalar_lea.vmem [#allocation7], %s2010_s6 }
  0x8e   : > { %s308_s26 = sshll.u32 %s300_s3, 4  ;;  %s2481_s30 = sand.u32 1, %s1781_s29   ;;  %s309_s26 = int_to_ptr.vmem [resolvable:$true] %s308_s26 }
  0x8f   : > { %s297_s16 = scalar_lea.sflag [#allocation8], %s2481_s30  ;;  %s1539_s25 = scalar_lea.hbm %s2116_s9, 64 }
  0x90   : > { %p1540_p10 = scmp.ne.s32.totalorder %s2116_s9, %s1539_s25  ;;  %p2482_p2 = scmp.ne.s32.totalorder %s2474_s22, 0 }
  0x91   : > { %s1544_s8 = scalar_lea.hbm %s2408_s0, 128  ;;  %p1545_p7 = scmp.lt.u32.totalorder %s2116_s9, %s2408_s0 }
  0x92   : > { %p2483_p0 = pneg %p2482_p2  ;;  %p1546_p9 = scmp.lt.u32.totalorder %s1544_s8, %s1539_s25 }
  0x93   : > { %p1548_p4 = scmp.lt.u32.totalorder %s1539_s25, %s2116_s9 }
  0x94   : > { %p1542_p1 = pnand %p1540_p10, %p2483_p0  ;;  %p1547_p11 = por %p1546_p9, %p1545_p7 }
  0x96   : > { %p1543_p3 = pneg %p1542_p1  ;;  %p1549_p13 = por %p1548_p4, %p1547_p11 }
  0x98   : > { %p1550_p6 = pnand %p1549_p13, %p1543_p3 }
  0x9a   : > { %1553 = shalt.err (!%p1550_p6)
}
  0x9b   : > { %s1554_s3 = scalar_lea.vmem %s309_s26, 64  ;;  %p2484_p10 = pmov %p2483_p0 }
  0x9c   : > { %p1555_p8 = scmp.ne.s32.totalorder %s309_s26, %s1554_s3  ;;  %s1808_s6 = smov [#allocation7]  }
  0x9d   : > { %s1559_s30 = sshll.u32 %s1808_s6, 4  ;;  %s1560_s30 = int_to_ptr.vmem [resolvable:$false] %s1559_s30 }
  0x9e   : > { %p1557_p0 = pnand %p1555_p8, %p2484_p10  ;;  %s1561_s7 = scalar_lea.vmem %s1560_s30, 128 }
  0x9f   : > { %p1562_p12 = scmp.lt.s32.totalorder %s309_s26, %s1560_s30  ;;  %p1563_p5 = scmp.lt.s32.totalorder %s1561_s7, %s1554_s3 }
  0xa0   : > { %p1558_p1 = pneg %p1557_p0 }
  0xa1   : > { %p1564_p7 = por %p1563_p5, %p1562_p12 }
  0xa3   : > { %p1565_p9 = pnand %p1564_p7, %p1558_p1 }
  0xa5   : > { %1568 = shalt.err (!%p1565_p9)
}
  0xa6   : > { %1315 = dma.hbm_to_vmem [thread:$0]  (!%p2482_p2), %s2116_s9, 64, %s309_s26, %s297_s16  }
  0xa7   : > { %s2144_s19 = scalar_lea.hbm %s2410_s2, %s2067_s27  ;;  %s338_s8 = scalar_lea.vmem [#allocation12], %s2064_s17 }
  0xa8   : > { %s345_s13 = sshll.u32 %s338_s8, 4  ;;  %s1569_s20 = scalar_lea.hbm %s2144_s19, 256  ;;  %s2147_s13 = int_to_ptr.vmem [resolvable:$true] %s345_s13 }
  0xa9   : > { %p1570_p12 = scmp.ne.s32.totalorder %s2144_s19, %s1569_s20  ;;  %p2485_p5 = scmp.ne.s32.totalorder %s2478_s23, 0 }
  0xaa   : > { %s1574_s16 = scalar_lea.hbm %s2410_s2, 512  ;;  %p1575_p2 = scmp.lt.u32.totalorder %s2144_s19, %s2410_s2 }
  0xab   : > { %p1572_p3 = pnand %p1570_p12, %p2485_p5  ;;  %p1576_p4 = scmp.lt.u32.totalorder %s1574_s16, %s1569_s20 }
  0xac   : > { %p1578_p6 = scmp.lt.u32.totalorder %s1569_s20, %s2144_s19 }
  0xad   : > { %p1573_p11 = pneg %p1572_p3  ;;  %p1577_p13 = por %p1576_p4, %p1575_p2 }
  0xaf   : > { %p1579_p8 = por %p1578_p6, %p1577_p13 }
  0xb1   : > { %p1580_p10 = pnand %p1579_p8, %p1573_p11 }
  0xb3   : > { %1583 = shalt.err (!%p1580_p10)
}
  0xb4   : > { %s1584_s6 = scalar_lea.vmem %s2147_s13, 256  ;;  %s1809_s30 = smov [#allocation12]  }
  0xb5   : > { %p1585_p0 = scmp.ne.s32.totalorder %s2147_s13, %s1584_s6  ;;  %s1589_s7 = sshll.u32 %s1809_s30, 4  ;;  %s1590_s7 = int_to_ptr.vmem [resolvable:$false] %s1589_s7 }
  0xb6   : > { %s1591_s25 = scalar_lea.vmem %s1590_s7, 512  ;;  %p1592_p9 = scmp.lt.s32.totalorder %s2147_s13, %s1590_s7 }
  0xb7   : > { %p1587_p1 = pnand %p1585_p0, %p2485_p5  ;;  %p1593_p12 = scmp.lt.s32.totalorder %s1591_s25, %s1584_s6 }
  0xb9   : > { %p1588_p7 = pneg %p1587_p1  ;;  %p1594_p3 = por %p1593_p12, %p1592_p9 }
  0xbb   : > { %p1595_p2 = pnand %p1594_p3, %p1588_p7 }
  0xbd   : > { %1598 = shalt.err (!%p1595_p2)
}
  0xbe   : > { %p2486_p11 = scmp.ne.s32.totalorder %s2476_s21, 0  ;;  %s2487_s1 = scalar_lea.sflag [#allocation11], %s2017_s24 }
  0xbf   : > { %s2179_s22 = scalar_lea.hbm %s2412_s4, %s2067_s27  ;;  %s380_s26 = scalar_lea.vmem [#allocation15], %s2064_s17 }
  0xc0   : > { %1321 = dma.hbm_to_vmem [thread:$0]  (!%p2486_p11), %s2144_s19, 256, %s2147_s13, %s2487_s1, %s1806_s11, %s1806_s11, %s1807_s14  }
  0xc1   : > { %s387_s16 = sshll.u32 %s380_s26, 4  ;;  %s1599_s9 = scalar_lea.hbm %s2179_s22, 256  ;;  %s2182_s16 = int_to_ptr.vmem [resolvable:$true] %s387_s16 }
  0xc2   : > { %p1600_p4 = scmp.ne.s32.totalorder %s2179_s22, %s1599_s9  ;;  %s1604_s13 = scalar_lea.hbm %s2412_s4, 512 }
  0xc3   : > { %p1605_p8 = scmp.lt.u32.totalorder %s2179_s22, %s2412_s4  ;;  %p1606_p10 = scmp.lt.u32.totalorder %s1604_s13, %s1599_s9 }
  0xc4   : > { %p1602_p13 = pnand %p1600_p4, %p2485_p5  ;;  %p1608_p1 = scmp.lt.u32.totalorder %s1599_s9, %s2179_s22 }
  0xc5   : > { %p1607_p0 = por %p1606_p10, %p1605_p8 }
  0xc6   : > { %p1603_p6 = pneg %p1602_p13 }
  0xc7   : > { %p1609_p7 = por %p1608_p1, %p1607_p0 }
  0xc9   : > { %p1610_p9 = pnand %p1609_p7, %p1603_p6 }
  0xcb   : > { %1613 = shalt.err (!%p1610_p9)
}
  0xcc   : > { %s1614_s7 = scalar_lea.vmem %s2182_s16, 256  ;;  %s1810_s25 = smov [#allocation15]  }
  0xcd   : > { %p1615_p12 = scmp.ne.s32.totalorder %s2182_s16, %s1614_s7  ;;  %s1619_s1 = sshll.u32 %s1810_s25, 4  ;;  %s1620_s1 = int_to_ptr.vmem [resolvable:$false] %s1619_s1 }
  0xce   : > { %s1621_s8 = scalar_lea.vmem %s1620_s1, 512  ;;  %p1622_p4 = scmp.lt.s32.totalorder %s2182_s16, %s1620_s1 }
  0xcf   : > { %p1617_p3 = pnand %p1615_p12, %p2485_p5  ;;  %p1623_p13 = scmp.lt.s32.totalorder %s1621_s8, %s1614_s7 }
  0xd1   : > { %p1618_p2 = pneg %p1617_p3  ;;  %p1624_p8 = por %p1623_p13, %p1622_p4 }
  0xd3   : > { %p1625_p10 = pnand %p1624_p8, %p1618_p2 }
  0xd5   : > { %1628 = shalt.err (!%p1625_p10)
}
  0xd6   : > { %s2488_s20 = scalar_lea.sflag [#allocation14], %s2017_s24  ;;  %s2214_s3 = scalar_lea.hbm %s2413_s5, %s2067_s27 }
  0xd7   : > { %1327 = dma.hbm_to_vmem [thread:$0]  (!%p2486_p11), %s2179_s22, 256, %s2182_s16, %s2488_s20, %s1806_s11, %s1806_s11, %s1807_s14  }
  0xd8   : > { %s401_s19 = scalar_lea.vmem [#allocation16], %s2064_s17  ;;  %s398_s6 = scalar_lea.sflag [#allocation17], %s2017_s24 }
  0xd9   : > { %s408_s13 = sshll.u32 %s401_s19, 4  ;;  %s1629_s30 = scalar_lea.hbm %s2214_s3, 256  ;;  %s2217_s13 = int_to_ptr.vmem [resolvable:$true] %s408_s13 }
  0xda   : > { %p1630_p6 = scmp.ne.s32.totalorder %s2214_s3, %s1629_s30  ;;  %s1634_s7 = scalar_lea.hbm %s2413_s5, 512 }
  0xdb   : > { %p1635_p7 = scmp.lt.u32.totalorder %s2214_s3, %s2413_s5  ;;  %p1636_p9 = scmp.lt.u32.totalorder %s1634_s7, %s1629_s30 }
  0xdc   : > { %p1632_p0 = pnand %p1630_p6, %p2485_p5  ;;  %p1638_p3 = scmp.lt.u32.totalorder %s1629_s30, %s2214_s3 }
  0xdd   : > { %p1637_p12 = por %p1636_p9, %p1635_p7 }
  0xde   : > { %p1633_p1 = pneg %p1632_p0 }
  0xdf   : > { %p1639_p2 = por %p1638_p3, %p1637_p12 }
  0xe1   : > { %p1640_p4 = pnand %p1639_p2, %p1633_p1 }
  0xe3   : > { %1643 = shalt.err (!%p1640_p4)
}
  0xe4   : > { %s1644_s17 = scalar_lea.vmem %s2217_s13, 256  ;;  %s1811_s1 = smov [#allocation16]  }
  0xe5   : > { %p1645_p13 = scmp.ne.s32.totalorder %s2217_s13, %s1644_s17  ;;  %s1649_s8 = sshll.u32 %s1811_s1, 4  ;;  %s1650_s8 = int_to_ptr.vmem [resolvable:$false] %s1649_s8 }
  0xe6   : > { %s1651_s20 = scalar_lea.vmem %s1650_s8, 512  ;;  %p1652_p6 = scmp.lt.s32.totalorder %s2217_s13, %s1650_s8 }
  0xe7   : > { %p1647_p8 = pnand %p1645_p13, %p2485_p5  ;;  %p1653_p0 = scmp.lt.s32.totalorder %s1651_s20, %s1644_s17 }
  0xe9   : > { %p1648_p10 = pneg %p1647_p8  ;;  %p1654_p7 = por %p1653_p0, %p1652_p6 }
  0xeb   : > { %p1655_p9 = pnand %p1654_p7, %p1648_p10 }
  0xed   : > { %1658 = shalt.err (!%p1655_p9)
}
  0xee   : > { %1330 = dma.hbm_to_vmem [thread:$0]  (!%p2486_p11), %s2214_s3, 256, %s2217_s13, %s398_s6, %s1806_s11, %s1806_s11, %s1807_s14  }
  0xef   : > { %p2489_p5 = scmp.ne.s32.totalorder %s2461_s18, 0 }
  0xf0   : > { %s2249_s23 = sand.u32 (!%p2489_p5), 1, %s1777_s28   ;;  %p2490_p1 = scmp.ne.s32.totalorder (!%p2489_p5), %s2456_s15, 0 }
  0xf1   : > { %420 = sbr.rel (%p2489_p5) target bundleno = 1565 (0x61d), region = 48  ;;  %s1195_s26 = sshll.u32 (!%p2489_p5), %s2249_s23, 2 }
  0xf2   : > { %s423_s9 = scalar_lea.sflag (!%p2489_p5), [#allocation8], %s2249_s23  ;;  %s2253_s21 = scalar_lea.vmem (!%p2489_p5), [#allocation7], %s1195_s26 }
  0xf8   : > { %1732 = dma.done.wait (%p2490_p1), %s423_s9, 64  }
  0xf9   : > { %1734 = vsyncadd (%p2490_p1), %s423_s9, 4294967232  ;;  %s431_s24 = sand.u32 1, %s1912_s12   ;;  %s2260_s11 = scalar_lea.vmem [#allocation10], %s1195_s26 }
  0xfa   : > { %s432_s18 = scalar_lea.sflag [#allocation11], %s431_s24 }
  0xfb   : > { %1736 = dma.done.wait (%p2490_p1), %s432_s18, 64  }
  0xfc   : > { %1738 = vsyncadd (%p2490_p1), %s432_s18, 4294967232  ;;  %s2491_s14 = sld [smem:[#allocation27_spill]]  ;;  %s2492_s3 = sld [smem:[#allocation34_spill]] }
 0x102   : > { %s442_s19 = sand.u32 1, %s2491_s14   ;;  %p2493_p11 = scmp.ne.s32.totalorder %s2492_s3, 0 }
 0x103   : > { %s2267_s13 = sshll.u32 %s442_s19, 4 }
 0x104   : > { %s444_s6 = scalar_lea.vmem [#allocation12], %s2267_s13 }
 0x105   : > { %1740 = dma.done.wait (%p2493_p11), %s432_s18, 256  }
 0x106   : > { %1742 = vsyncadd (%p2493_p11), %s432_s18, 4294967040  ;;  %s450_s30 = scalar_lea.sflag [#allocation14], %s431_s24  ;;  %s453_s22 = scalar_lea.vmem [#allocation13], %s2267_s13 }
 0x107   : > { %1744 = dma.done.wait (%p2493_p11), %s450_s30, 512  }
 0x108   : > { %1746 = vsyncadd (%p2493_p11), %s450_s30, 4294966784  ;;  %s462_s15 = scalar_lea.vmem [#allocation15], %s2267_s13  ;;  %s468_s16 = scalar_lea.sflag [#allocation17], %s431_s24 }
 0x109   : > { %s471_s7 = scalar_lea.vmem [#allocation16], %s2267_s13 }
 0x10a   : > { %1748 = dma.done.wait (%p2493_p11), %s468_s16, 256  }
 0x10b   : > { %1750 = vsyncadd (%p2493_p11), %s468_s16, 4294967040  ;;  %p2494_p12 = scmp.eq.s32.totalorder %s1912_s12, 0 }
 0x10d   : > { %1752 = dma.done.wait (%p2494_p12), [#allocation17], 16   ;;  %p2495_p3 = pmov %p2494_p12 }
 0x10e   : > { %s2496_s27 = sld [smem:[#allocation30_spill]]  ;;  %s1202_s25 = sshll.u32 %s2249_s23, 3 }
 0x10f   : > { %1754 = vsyncadd (%p2495_p3), [#allocation17], 4294967280  ;;  %s2291_s17 = scalar_lea.vmem [#allocation19], %s1202_s25 }
 0x114   : > { %p532_p2 = scmp.eq.s32.totalorder %s2496_s27, 0 }
 0x115   : > { %vm538_vm0 = vcmask (%p532_p2), 261120   ;;  %v1812_v0 = vmov (%p532_p2), 0.0  }
 0x116   : > { %537 = sbr.rel (!%p532_p2) target bundleno = 285 (0x11d), region = 80  ;;  %539 = vst.msk [vmem:[#allocation6] sm:$0xff] (%p532_p2), %vm538_vm0, %v1812_v0 }
 0x11d PF: > { %v1437_v1 = vld [vmem:[%s444_s6] sm:$0xff]   ;;  %v1813_v2 = vmov 0.0   ;;  %v1439_v4 = vld [vmem:[%s444_s6 + $0x8] sm:$0xff]   ;;  %vm1814_vm1 = vmmov 0   ;;  %vm560_vm2 = vcmask 261120   ;;  %vm605_vm3 = vcmask 257024  }
 0x11e   : > { %1246 = vmatprep.subr.bf16.mxu0 %v1813_v2  ;;  %1254 = vmatprep.subr.bf16.mxu1 %v1813_v2  ;;  %v1438_v3 = vld [vmem:[%s453_s22] sm:$0xff]   ;;  %v1440_v5 = vld [vmem:[%s453_s22 + $0x8] sm:$0xff]   ;;  %610 = vst.msk [vmem:[#allocation5] sm:$0xff] %vm560_vm2, %v1813_v2  ;;  %vm607_vm4 = vcmask 7168   ;;  %v1815_v21 = vmov -inf   ;;  %vm778_vm5 = vcmask 64512  }
 0x11f   : > { %1247 = vmatpush3.bf16.msra.mxu0 %v1437_v1  ;;  %1250 = vmatprep.mubr.msk.bf16.mxu0 %vm1814_vm1, %v1813_v2  ;;  %v543_v6 = vld [vmem:[%s2253_s21] sm:$0xf]  ;;  %v611_v7 = vld [vmem:[%s2260_s11] sm:$0xf]  ;;  %608 = vst.msk [vmem:[#allocation3] sm:$0xff] %vm607_vm4, %v1815_v21  ;;  %609 = vst.msk [vmem:[#allocation4] sm:$0xff] %vm607_vm4, %v1813_v2 }
 0x120   : > { %1255 = vmatpush3.bf16.msra.mxu1 %v1438_v3  ;;  %1248 = vmatprep.subr.bf16.mxu0 %v1813_v2  ;;  %v1441_v20 = vld [vmem:[%s462_s15] sm:$0xff]   ;;  %v1442_v22 = vld [vmem:[%s462_s15 + $0x8] sm:$0xff]   ;;  %v1816_v28 = vmov 0   ;;  %vm813_vm6 = vcmask 1043456   ;;  %s2497_s12 = sld [smem:[#allocation30_spill]] }
 0x121   : > { %1256 = vmatprep.subr.bf16.mxu1 %v1813_v2  ;;  %1258 = vmatprep.mubr.msk.bf16.mxu1 %vm1814_vm1, %v1813_v2  ;;  %v1443_v47 = vld [vmem:[%s471_s7] sm:$0xff]   ;;  %v1444_v54 = vld [vmem:[%s471_s7 + $0x8] sm:$0xff]  }
 0x122   : > { %1435 = vset.pattern.permute.xlu0 %v1816_v28  ;;  %1436 = vset.pattern.permute.xlu1 %v1816_v28  ;;  %v873_v3 = vld [vmem:[#allocation6] sm:$0xff] }
 0x123   : > { %1249 = vmatpush3.bf16.msra.mxu0 %v1439_v4 }
 0x124   : > { %1257 = vmatpush3.bf16.msra.mxu1 %v1440_v5  ;;  %1262 = vmatprep.subr.bf16.mxu0 %v1813_v2 }
 0x125   : > { %1270 = vmatprep.subr.bf16.mxu1 %v1813_v2  ;;  %v802_v55 = vld [vmem:[#allocation5] sm:$0xff] }
 0x126   : > { %1251 = vmatmul.mubr.msk.bf16.vlgmr.msra.gmra.mrb[0].mxu0 %vm560_vm2, %v543_v6  ;;  %v777_v29 = vld [vmem:[#allocation3] sm:$0xff]  ;;  %v794_v48 = vld [vmem:[#allocation4] sm:$0xff]  ;;  %p935_p4 = scmp.eq.s32.totalorder %s2497_s12, 1 }
 0x127   : > { %1259 = vmatmul.mubr.msk.bf16.vlgmr.msra.gmra.mrb[0].mxu1 %vm560_vm2, %v611_v7  ;;  %1266 = vmatprep.mubr.msk.bf16.mxu0 %vm1814_vm1, %v1813_v2 }
 0x128   : > { %1272 = vmatprep.mubr.msk.bf16.mxu1 %vm1814_vm1, %v1813_v2  ;;  %1263 = vmatpush3.bf16.msra.mxu0 %v1441_v20 }
 0x129   : > { %1264 = vmatprep.subr.bf16.mxu0 %v1813_v2 }
 0x12c   : > { %1265 = vmatpush3.bf16.msra.mxu0 %v1442_v22 }
 0x12d   : > { %1276 = vmatprep.subr.bf16.mxu0 %v1813_v2 }
 0x12f   : > { %1267 = vmatmul.mubr.msk.bf16.vlgmr.msra.gmra.mrb[4].mxu0 %vm560_vm2, %v611_v7 }
 0x130   : > { %1278 = vmatprep.mubr.msk.bf16.mxu0 %vm1814_vm1, %v1813_v2 }
 0x1f9   : > { %v598_v8 = vpop.f32.mrb[0].mxu0 }
 0x1fa   : > { %v604_v9 = vpack.c.bf16 %v598_v8, %v598_v8  ;;  %v666_v10 = vpop.f32.mrb[0].mxu1  ;;  %v1252_v11 = vpop.f32.mrb[1].mxu0 }
 0x1fb   : > { %v672_v12 = vpack.c.bf16 %v666_v10, %v666_v10  ;;  %v1260_v13 = vpop.f32.mrb[1].mxu1  ;;  %v601_v14 = vpop.f32.mrb[2].mxu0  ;;  %v1219_v10 = vld [vmem:[#allocation18] ss:$0 sm:$0xff] (%p935_p4) }
 0x1fc   : > { %606 = vst.msk [vmem:[#allocation2] sm:$0xf] %vm605_vm3, %v604_v9  ;;  %v669_v15 = vpop.f32.mrb[2].mxu1  ;;  %v1253_v16 = vpop.f32.mrb[3].mxu0 }
 0x1fd   : > { %v735_v17 = vsel %vm560_vm2, %v672_v12, 0  ;;  %v1261_v18 = vpop.f32.mrb[3].mxu1 }
 0x1fe   : > { %1271 = vmatpush3.bf16.xpose.msra.mxu1 %v735_v17 }
 0x1ff   : > { %1282 = vmatprep.subr.bf16.mxu1 %v1813_v2 }
 0x202   : > { %v723_v33 = vpop.f32.mrb[4].mxu0 }
 0x203   : > { %v730_v19 = vld [vmem:[#allocation2] sm:$0xf]  ;;  %v729_v34 = vpack.c.bf16 %v723_v33, %v723_v33  ;;  %v1268_v35 = vpop.f32.mrb[5].mxu0 }
 0x204   : > { %v726_v36 = vpop.f32.mrb[6].mxu0 }
 0x205   : > { %1273 = vmatmul.mubr.msk.bf16.vlgmr.msra.gmra.mrb[4].mxu1 %vm560_vm2, %v730_v19  ;;  %v815_v37 = vsel %vm813_vm6, %v729_v34, 0  ;;  %v1269_v38 = vpop.f32.mrb[7].mxu0 }
 0x206   : > { %1286 = vmatprep.mubr.msk.bf16.mxu1 %vm1814_vm1, %v1813_v2  ;;  %1277 = vmatpush3.bf16.msra.mxu0 %v815_v37 }
 0x207   : > { %1283 = vmatpush3.bf16.msra.mxu1 %v1443_v47 }
 0x208   : > { %1284 = vmatprep.subr.bf16.mxu1 %v1813_v2 }
 0x20b   : > { %1285 = vmatpush3.bf16.msra.mxu1 %v1444_v54 }
 0x2d8   : > { %v771_v23 = vpop.f32.mrb[4].mxu1 }
 0x2d9   : > { %v1274_v24 = vpop.f32.mrb[5].mxu1  ;;  %v779_v25 = vsel %vm778_vm5, %v771_v23, -inf }
 0x2da   : > { %780 = vmax.xlane.f32.xlu0 %v779_v25  ;;  %v774_v26 = vpop.f32.mrb[6].mxu1 }
 0x2db   : > { %v1275_v27 = vpop.f32.mrb[7].mxu1 }
 0x367   : > { %v781_v30 = vpop.xlane.xlu0 %780 }
 0x368   : > { %v782_v31 = vmax.f32 %v777_v29, %v781_v30 }
 0x36a   : > { %v783_v32 = vsub.f32 %v777_v29, %v782_v31  ;;  %859 = vst.msk [vmem:[#allocation3] sm:$0xff] %vm607_vm4, %v782_v31  ;;  %788 = vperm.xlu0 %1435, %v782_v31  }
 0x36c   : > { %v784_v45 = vmul.f32 1.442695, %v783_v32 }
 0x3e9   : > { %v789_v39 = vpop.permute.xlu0 %788 }
 0x3ea   : > { %v791_v40 = vsub.f32 %v771_v23, %v789_v39 }
 0x3ec   : > { %v792_v41 = vmul.f32 1.442695, %v791_v40 }
 0x3ee   : > { %1445 = vpow2.f32 %v792_v41 }
 0x3ef   : > { %1447 = vpow2.f32 %v784_v45 }
 0x3f8   : > { %v1446_v42 = vpop.eup %1445 }
 0x3f9   : > { %v796_v43 = vsel %vm778_vm5, %v1446_v42, 0.0  ;;  %v809_v44 = vpack.c.bf16 %v1446_v42, %v1446_v42  ;;  %v1448_v46 = vpop.eup %1447 }
 0x3fa   : > { %797 = vadd.xlane.f32.xlu1 %v796_v43  ;;  %v795_v49 = vmul.f32 %v1448_v46, %v794_v48 }
 0x3fb   : > { %1279 = vmatmul.mubr.msk.bf16.vlgmr.msra.gmra.mrb[8].mxu0 %vm778_vm5, %v809_v44 }
 0x40b   : > { %805 = vperm.xlu1 %1436, %v1448_v46  }
 0x487   : > { %v798_v50 = vpop.xlane.xlu1 %797 }
 0x488   : > { %v799_v51 = vadd.f32 %v798_v50, %v795_v49 }
 0x48a   : > { %801 = vst.msk [vmem:[#allocation4] sm:$0xff] %vm607_vm4, %v799_v51 }
 0x48b   : > { %v806_v56 = vpop.permute.xlu1 %805 }
 0x48c   : > { %v808_v57 = vmul.f32 %v806_v56, %v802_v55 }
 0x491   : > { %v863_v52 = vld [vmem:[#allocation4] sm:$0xff] }
 0x492   : > { %1449 = vrcp.f32 %v863_v52 }
 0x49c   : > { %v1450_v53 = vpop.eup %1449 }
 0x49d   : > { %868 = vperm.xlu1 %1436, %v1450_v53  }
 0x4ce   : > { %v851_v58 = vpop.f32.mrb[8].mxu0 }
 0x4cf   : > { %v857_v59 = vadd.f32 %v851_v58, %v808_v57  ;;  %v1280_v60 = vpop.f32.mrb[9].mxu0 }
 0x4d0   : > { %v854_v61 = vpop.f32.mrb[10].mxu0 }
 0x4d1   : > { %858 = vst.msk [vmem:[#allocation5] sm:$0xff] %vm560_vm2, %v857_v59  ;;  %v1281_v62 = vpop.f32.mrb[11].mxu0 }
 0x4d8   : > { %v865_v0 = vld [vmem:[#allocation5] sm:$0xff] }
 0x51c   : > { %v869_v63 = vpop.permute.xlu1 %868 }
 0x51d   : > { %v871_v1 = vmul.f32 %v869_v63, %v865_v0 }
 0x51f   : > { %v872_v2 = vpack.c.bf16 %v871_v1, %v871_v1 }
 0x521   : > { %1287 = vmatmul.mubr.msk.bf16.vlgmr.msra.gmra.mrb[8].mxu1 %vm560_vm2, %v872_v2 }
 0x5f1   : > { %939 = sbr.rel (!%p935_p4) target bundleno = 1538 (0x602), region = 92 }
 0x5f4   : > { %v927_v4 = vpop.f32.mrb[8].mxu1 }
 0x5f5   : > { %v933_v5 = vadd.f32 %v927_v4, %v873_v3  ;;  %v1288_v6 = vpop.f32.mrb[9].mxu1 }
 0x5f6   : > { %v930_v7 = vpop.f32.mrb[10].mxu1 }
 0x5f7   : > { %934 = vst.msk [vmem:[#allocation6] sm:$0xff] %vm560_vm2, %v933_v5  ;;  %v1289_v8 = vpop.f32.mrb[11].mxu1 }
 0x5fe   : > { %v940_v9 = vld [vmem:[#allocation6] sm:$0xff] }
 0x5ff   : > { %v948_v11 = vadd.f32 %v1219_v10, %v940_v9 }
 0x601   : > { %949 = vst.msk [vmem:[%s2291_s17] sm:$0xff] %vm560_vm2, %v948_v11 }
 0x602 PF: > { %s2498_s1 = sld [smem:[#allocation31_spill]]  ;;  %s2499_s8 = sld [smem:[#allocation39_spill]] }
 0x603   : > { %s2500_s21 = sld [smem:[#allocation44_spill]]  ;;  %s965_s18 = sshll.u32 %s2291_s17, 4  ;;  %s966_s18 = int_to_ptr.vmem [resolvable:$true] %s965_s18 }
 0x604   : > { %s951_s11 = scalar_lea.sflag [#allocation9], %s2249_s23  ;;  %s1659_s14 = scalar_lea.vmem %s966_s18, 128 }
 0x605   : > { %p1660_p13 = scmp.ne.s32.totalorder %s966_s18, %s1659_s14  ;;  %s1817_s3 = smov [#allocation19]  }
 0x606   : > { %s1663_s19 = sshll.u32 %s1817_s3, 4  ;;  %s1664_s19 = int_to_ptr.vmem [resolvable:$false] %s1663_s19 }
 0x607   : > { %s1665_s13 = scalar_lea.vmem %s1664_s19, 256  ;;  %p1666_p0 = scmp.lt.s32.totalorder %s966_s18, %s1664_s19 }
 0x608   : > { %s1221_s20 = sshll.u32 %s2498_s1, 7  ;;  %p2501_p8 = scmp.ne.s32.totalorder %s2499_s8, 0 }
 0x609   : > { %s2350_s24 = scalar_lea.hbm %s2500_s21, %s1221_s20  ;;  %p1667_p7 = scmp.lt.s32.totalorder %s1665_s13, %s1659_s14 }
 0x60a   : > { %p1661_p10 = pnand %p1660_p13, %p2501_p8 }
 0x60b   : > { %p1668_p9 = por %p1667_p7, %p1666_p0 }
 0x60c   : > { %p1662_p6 = pneg %p1661_p10 }
 0x60e   : > { %p1669_p5 = pnand %p1668_p9, %p1662_p6 }
 0x610   : > { %1672 = shalt.err (!%p1669_p5)
}
 0x611   : > { %s1673_s23 = scalar_lea.hbm %s2350_s24, 128  ;;  %s1677_s22 = scalar_lea.hbm %s2500_s21, 256 }
 0x612   : > { %p1674_p1 = scmp.ne.s32.totalorder %s2350_s24, %s1673_s23  ;;  %p1678_p3 = scmp.lt.u32.totalorder %s2350_s24, %s2500_s21 }
 0x613   : > { %p1679_p2 = scmp.lt.u32.totalorder %s1677_s22, %s1673_s23  ;;  %p1681_p13 = scmp.lt.u32.totalorder %s1673_s23, %s2350_s24 }
 0x614   : > { %p1675_p11 = pnand %p1674_p1, %p2501_p8 }
 0x615   : > { %p1680_p4 = por %p1679_p2, %p1678_p3 }
 0x616   : > { %p1676_p12 = pneg %p1675_p11 }
 0x617   : > { %p1682_p10 = por %p1681_p13, %p1680_p4 }
 0x619   : > { %p1683_p6 = pnand %p1682_p10, %p1676_p12 }
 0x61b   : > { %1686 = shalt.err (!%p1683_p6)
}
 0x61c   : > { %1306 = dma.vmem_to_hbm [thread:$0]  (%p2501_p8), %s966_s18, 128, %s2350_s24, %s951_s11  }
 0x61d PF: > { %s2502_s7 = sld [smem:[#allocation33_spill]]  ;;  %s2503_s27 = sld [smem:[#allocation29_spill]] }
 0x61e   : > { %s2504_s25 = sld [smem:[#allocation35_spill]] }
 0x623   : > { %p1338_p0 = scmp.ge.s32.totalorder %s2502_s7, 2  ;;  %s977_s17 = sand.u32 1, %s2503_s27  }
 0x624   : > { %p2505_p7 = scmp.ne.s32.totalorder %s2504_s25, 0  ;;  %s978_s12 = scalar_lea.sflag [#allocation9], %s977_s17 }
 0x626   : > { %p1332_p9 = pnand %p1338_p0, %p2505_p7 }
 0x628   : > { %1756 = dma.done.wait (!%p1332_p9), %s978_s12, 128  }
 0x629   : > { %1758 = vsyncadd (!%p1332_p9), %s978_s12, 4294967168  ;;  %s32_s11 = sadd.s32 1, %s2502_s7   ;;  %s2506_s24 = sld [smem:[#allocation27_spill]] }
 0x62a   : > { %p29_p5 = scmp.ge.s32.totalorder %s32_s11, 6   ;;  %s2507_s25 = sld [smem:[#allocation28_spill]] }
 0x62b   : > { %s2508_s26 = sld [smem:[#allocation38_spill]]  ;;  %s2509_s1 = sld [smem:[#allocation40_spill]] }
 0x62c   : > { %s2510_s30 = sld [smem:[#allocation32_spill]]  ;;  %s2511_s9 = sld [smem:[#allocation36_spill]] }
 0x62d   : > { %s2512_s20 = sld [smem:[#allocation37_spill]]  ;;  %s2513_s27 = smov %s1777_s28 }
 0x62e   : > { %s2514_s28 = smov %s1781_s29  ;;  %s2516_s8 = smov %s1797_s10 }
 0x62f   :  { %31 = sbr.rel (!%p29_p5) target bundleno = 20 (0x14), region = 174 }
 0x631   : > { %s2515_s29 = smov %s2509_s1 }
 0x633   : > { %s2517_s10 = smov %s2512_s20 }
 0x636   :  { %983 = vsyncpa [#allocation8], 1 }
 0x637   :  { %985 = vsyncpa [#allocation8 + $0x1], 1 }
 0x638   :  { %986 = vsyncpa [#allocation11], 1 }
 0x639   :  { %988 = vsyncpa [#allocation11 + $0x1], 1 }
 0x63a   :  { %989 = vsyncpa [#allocation14], 1 }
 0x63b   :  { %991 = vsyncpa [#allocation14 + $0x1], 1 }
 0x63c   :  { %992 = vsyncpa [#allocation17], 1 }
 0x63d   :  { %994 = vsyncpa [#allocation17 + $0x1], 1 }
 0x63e   :  { %995 = vsyncpa [#allocation9], 1 }
 0x63f   :  { %997 = vsyncpa [#allocation9 + $0x1], 1 }

</bundles_post_ra>
